<compile_context>
chip_gen: v5e
topology: v5e:2x2
jax: 0.10.0
libtpu: 0.0.40
codegen_flags: <defaults>
</compile_context>

<pallas_src>
import jax
import jax.numpy as jnp
from jax import lax
from jax.experimental import pallas as pl
from jax.experimental.pallas import tpu as pltpu


# ---------------------------------------------------------------------------
# Kernels
# ---------------------------------------------------------------------------

def _kernel_out1(h_ref, w_ref, b_ref, o_ref):
    """out_sz == 1 path: one VPU multiply + one lane reduce, scalar bias in SMEM.

    h_ref: (tb, in_sz)  VMEM
    w_ref: (1,  in_sz)  VMEM   (PyTorch nn.Linear layout, single buffered)
    b_ref: (1,)         SMEM
    o_ref: (tb, 1)      VMEM
    """
    h = h_ref[...].astype(jnp.float32)
    w = w_ref[...].astype(jnp.float32)
    col = jnp.sum(h * w, axis=-1, keepdims=True)          # (tb, 1), f32 accum
    o_ref[...] = (col + b_ref[0]).astype(o_ref.dtype)


def _kernel_mxu(h_ref, w_ref, b_ref, o_ref, acc_ref):
    """General path: MXU matmul against PyTorch-layout weight, K-tiled.

    h_ref: (tb, tk)        VMEM
    w_ref: (out_sz, tk)    VMEM
    b_ref: (1, out_sz)     VMEM
    o_ref: (tb, out_sz)    VMEM (resident across the K axis)
    acc_ref: (tb, out_sz)  f32 VMEM scratch
    """
    k = pl.program_id(1)

    @pl.when(k == 0)
    def _():
        acc_ref[...] = jnp.zeros_like(acc_ref)

    # Contract h dim 1 with w dim 1: transposed RHS is handled natively by the
    # MXU, so the weight is never transposed (neither in the wrapper nor here).
    acc_ref[...] += lax.dot_general(
        h_ref[...], w_ref[...],
        dimension_numbers=(((1,), (1,)), ((), ())),
        preferred_element_type=jnp.float32,
    )

    @pl.when(k == pl.num_programs(1) - 1)
    def _():
        o_ref[...] = (acc_ref[...] + b_ref[...].astype(jnp.float32)).astype(o_ref.dtype)


# ---------------------------------------------------------------------------
# Tiling helpers
# ---------------------------------------------------------------------------

_VMEM_BUDGET = 16 * 1024 * 1024   # conservative working budget (ok on v5e/v6e/v7x)


def _choose_tk(in_sz):
    """K tile: full in_sz when small, else the largest nice divisor."""
    if in_sz <= 2048:
        return in_sz
    for cand in (2048, 1024, 512, 256, 128):
        if in_sz % cand == 0:
            return cand
    return in_sz


def _choose_block_b(B, row_bytes, fixed_bytes, budget=_VMEM_BUDGET):
    """Largest batch tile that fits the VMEM budget; >=2 grid points when B>=16."""
    if B <= 8:
        return B                              # shipped case: grid=(1,), no extra steps
    avail = max(budget - fixed_bytes, row_bytes * 8)
    block_b = min(B, max(8, (avail // row_bytes) // 8 * 8), 1024)
    if B >= 16:
        # Force at least 2 grid points so v7x's second TensorCore gets work.
        half = max(8, (((B + 1) // 2) // 8) * 8)
        block_b = min(block_b, half)
    if block_b != B:
        block_b = max(8, (block_b // 8) * 8)  # (8, 128) sublane constraint
    return block_b


# ---------------------------------------------------------------------------
# Forward implementation (pallas_call wrapper)
# ---------------------------------------------------------------------------

def _baseline_forward(h_t, weight, bias):
    h_t = lax.stop_gradient(h_t)              # mirrors h_t.detach()
    B, in_sz = h_t.shape
    out_sz, in_sz_w = weight.shape
    assert in_sz == in_sz_w, (in_sz, in_sz_w)

    elt = h_t.dtype.itemsize
    w_elt = weight.dtype.itemsize

    cost = pl.CostEstimate(
        flops=2 * B * in_sz * out_sz,
        transcendentals=0,
        bytes_accessed=(elt * B * in_sz + w_elt * out_sz * in_sz
                        + bias.dtype.itemsize * out_sz + elt * B * out_sz),
    )

    if out_sz == 1:
        # --- out_sz == 1: VPU multiply + single lane reduce -----------------
        row_bytes = 2 * in_sz * elt + 2 * elt + 4          # h dbl-buf + out dbl-buf
        fixed = in_sz * w_elt + 1024                       # single-buffered weight
        block_b = _choose_block_b(B, row_bytes, fixed)
        grid = (pl.cdiv(B, block_b),)
        vmem_est = block_b * row_bytes + fixed
        vmem_limit = int(min(max(2 * vmem_est + (1 << 20), 16 << 20), 64 << 20))

        return pl.pallas_call(
            _kernel_out1,
            out_shape=jax.ShapeDtypeStruct((B, 1), h_t.dtype),
            grid=grid,
            in_specs=[
                pl.BlockSpec((block_b, in_sz), lambda i: (i, 0)),
                pl.BlockSpec((1, in_sz), lambda i: (0, 0),
                             pipeline_mode=pl.Buffered(1)),   # grid-invariant weight
                pl.BlockSpec(memory_space=pltpu.MemorySpace.SMEM),
            ],
            out_specs=pl.BlockSpec((block_b, 1), lambda i: (i, 0)),
            compiler_params=pltpu.CompilerParams(
                dimension_semantics=("parallel",),
                vmem_limit_bytes=vmem_limit,
            ),
            cost_estimate=cost,
        )(h_t, weight, bias)

    # --- out_sz >= 2: MXU path with K-tiled f32 accumulator -----------------
    tk = _choose_tk(in_sz)
    nk = pl.cdiv(in_sz, tk)
    w_bufs = 1 if nk == 1 else 2

    row_bytes = 2 * tk * elt + 2 * out_sz * elt + out_sz * 4
    fixed = w_bufs * out_sz * tk * w_elt + 2 * out_sz * 4
    block_b = _choose_block_b(B, row_bytes, fixed)
    nb = pl.cdiv(B, block_b)

    vmem_est = block_b * row_bytes + fixed
    vmem_limit = int(min(max(2 * vmem_est + (1 << 20), 16 << 20), 64 << 20))

    w_spec_kwargs = dict(pipeline_mode=pl.Buffered(1)) if nk == 1 else {}
    bias2d = bias.reshape(1, out_sz)

    return pl.pallas_call(
        _kernel_mxu,
        out_shape=jax.ShapeDtypeStruct((B, out_sz), h_t.dtype),
        grid=(nb, nk),
        in_specs=[
            pl.BlockSpec((block_b, tk), lambda i, k: (i, k)),
            pl.BlockSpec((out_sz, tk), lambda i, k: (0, k), **w_spec_kwargs),
            pl.BlockSpec((1, out_sz), lambda i, k: (0, 0),
                         pipeline_mode=pl.Buffered(1)),       # grid-invariant bias
        ],
        out_specs=pl.BlockSpec((block_b, out_sz), lambda i, k: (i, 0)),
        scratch_shapes=[pltpu.VMEM((block_b, out_sz), jnp.float32)],
        compiler_params=pltpu.CompilerParams(
            dimension_semantics=("parallel", "arbitrary"),
            vmem_limit_bytes=vmem_limit,
        ),
        cost_estimate=cost,
    )(h_t, weight, bias2d)


# ---------------------------------------------------------------------------
# Public entry point: differentiable w.r.t. weight/bias, no grad to h_t (detach)
# ---------------------------------------------------------------------------

@jax.custom_vjp
def baseline_network(h_t, weight, bias):
    """b_t = Linear(h_t.detach()); h_t: (B, in), weight: (out, in), bias: (out,)."""
    return _baseline_forward(h_t, weight, bias)


def _baseline_fwd(h_t, weight, bias):
    out = _baseline_forward(h_t, weight, bias)
    return out, (lax.stop_gradient(h_t), weight, bias)


def _baseline_bwd(res, g):
    h_det, weight, bias = res
    g32 = g.astype(jnp.float32)
    d_w = jnp.einsum("bo,bi->oi", g32, h_det.astype(jnp.float32)).astype(weight.dtype)
    d_b = jnp.sum(g32, axis=0).astype(bias.dtype)
    d_h = jnp.zeros_like(h_det)               # detach: no gradient to h_t
    return d_h, d_w, d_b


baseline_network.defvjp(_baseline_fwd, _baseline_bwd)


# ---------------------------------------------------------------------------
# Self-test
# ---------------------------------------------------------------------------

if __name__ == "__main__":
    key = jax.random.PRNGKey(0)

    # --- Shipped module shapes: B=8, input_size=32, output_size=1 (VPU path) ---
    B, INPUT_SIZE, OUTPUT_SIZE = 8, 32, 1
    k_h, k_w, k_b, key = jax.random.split(key, 4)
    bound = 1.0 / (INPUT_SIZE ** 0.5)
    weight = jax.random.uniform(k_w, (OUTPUT_SIZE, INPUT_SIZE),
                                minval=-bound, maxval=bound, dtype=jnp.float32)
    bias = jax.random.uniform(k_b, (OUTPUT_SIZE,),
                              minval=-bound, maxval=bound, dtype=jnp.float32)
    h_t = jax.random.normal(k_h, (B, INPUT_SIZE), dtype=jnp.float32)

    b_t = baseline_network(h_t, weight, bias)
    jax.block_until_ready(b_t)

    ref = h_t @ weight.T + bias
    assert b_t.shape == (B, OUTPUT_SIZE), b_t.shape
    assert jnp.allclose(b_t, ref, atol=1e-5, rtol=1e-5), "mismatch (out_sz=1 path)"

    # Gradient sanity check (weight/bias grads flow; h_t is detached).
    def loss(w, b, h):
        return jnp.sum(baseline_network(h, w, b) ** 2)

    g_w, g_b, g_h = jax.grad(loss, argnums=(0, 1, 2))(weight, bias, h_t)
    ref_out = h_t @ weight.T + bias
    ref_gw = (2.0 * ref_out).T @ h_t
    ref_gb = jnp.sum(2.0 * ref_out, axis=0)
    assert jnp.allclose(g_w, ref_gw, atol=1e-4, rtol=1e-4), "weight grad mismatch"
    assert jnp.allclose(g_b, ref_gb, atol=1e-4, rtol=1e-4), "bias grad mismatch"
    assert jnp.allclose(g_h, jnp.zeros_like(h_t)), "h_t should receive no gradient"

    # --- Wider-output sanity check (MXU path, >=2 batch blocks on v7x) ---------
    B2, IN2, OUT2 = 16, 256, 128
    k_h2, k_w2, k_b2, key = jax.random.split(key, 4)
    bound2 = 1.0 / (IN2 ** 0.5)
    weight2 = jax.random.uniform(k_w2, (OUT2, IN2),
                                 minval=-bound2, maxval=bound2, dtype=jnp.float32)
    bias2 = jax.random.uniform(k_b2, (OUT2,),
                               minval=-bound2, maxval=bound2, dtype=jnp.float32)
    h_t2 = jax.random.normal(k_h2, (B2, IN2), dtype=jnp.float32)

    b_t2 = baseline_network(h_t2, weight2, bias2)
    jax.block_until_ready(b_t2)

    ref2 = h_t2 @ weight2.T + bias2
    assert b_t2.shape == (B2, OUT2), b_t2.shape
    assert jnp.allclose(b_t2, ref2, atol=1e-4, rtol=1e-4), "mismatch (MXU path)"

    print("KERNEL_OK")
</pallas_src>

<mosaic_0001>
module attributes {stable_mosaic.version = 11 : i64} {
  func.func @_kernel_out1(%arg0: i32, %arg1: memref<8x32xf32, #tpu.memory_space<vmem>>, %arg2: memref<1x32xf32, #tpu.memory_space<vmem>>, %arg3: memref<1xf32, #tpu.memory_space<smem>>, %arg4: memref<8x1xf32, #tpu.memory_space<vmem>>) attributes {dimension_semantics = [#tpu.dimension_semantics<parallel>], iteration_bounds = array<i64: 1>, scalar_prefetch = 0 : i64, scratch_operands = 0 : i64, tpu.core_type = #tpu.core_type<tc>, window_params = [{transform_indices = @transform_0, window_bounds = array<i64: 8, 32>}, {pipeline_mode = #tpu.pipeline_mode<synchronous>, transform_indices = @transform_1, window_bounds = array<i64: 1, 32>}, {transform_indices = @transform_2, window_bounds = array<i64: 1>}, {transform_indices = @transform_3, window_bounds = array<i64: 8, 1>}]} {
    %c0 = arith.constant 0 : index
    %c0_0 = arith.constant 0 : index
    %0 = vector.load %arg1[%c0, %c0_0] : memref<8x32xf32, #tpu.memory_space<vmem>>, vector<8x32xf32>
    %c0_1 = arith.constant 0 : index
    %c0_2 = arith.constant 0 : index
    %1 = vector.load %arg2[%c0_1, %c0_2] : memref<1x32xf32, #tpu.memory_space<vmem>>, vector<1x32xf32>
    %2 = vector.broadcast %1 : vector<1x32xf32> to vector<8x32xf32>
    %3 = arith.mulf %0, %2 : vector<8x32xf32>
    %cst = arith.constant dense<0.000000e+00> : vector<8xf32>
    %4 = vector.multi_reduction <add>, %3, %cst [1] : vector<8x32xf32> to vector<8xf32>
    %5 = vector.shape_cast %4 : vector<8xf32> to vector<8x1xf32>
    %c0_3 = arith.constant 0 : index
    %6 = memref.load %arg3[%c0_3] : memref<1xf32, #tpu.memory_space<smem>>
    %7 = vector.broadcast %6 : f32 to vector<8x1xf32>
    %8 = arith.addf %5, %7 : vector<8x1xf32>
    %c0_4 = arith.constant 0 : index
    %c0_5 = arith.constant 0 : index
    %9 = vector.load %arg4[%c0_4, %c0_5] : memref<8x1xf32, #tpu.memory_space<vmem>>, vector<8x1xf32>
    tpu.vector_store %arg4[%c0_4, %c0_5], %8 {strides = array<i32>} : memref<8x1xf32, #tpu.memory_space<vmem>>, vector<8x1xf32>,
    return
  }
  func.func @transform_0(%arg0: i32) -> (i32, i32) {
    %c0_i32 = arith.constant 0 : i32
    %c0_i32_0 = arith.constant 0 : i32
    return %arg0, %c0_i32 : i32, i32
  }
  func.func @transform_1(%arg0: i32) -> (i32, i32) {
    %c0_i32 = arith.constant 0 : i32
    %c0_i32_0 = arith.constant 0 : i32
    %c0_i32_1 = arith.constant 0 : i32
    return %c0_i32, %c0_i32_0 : i32, i32
  }
  func.func @transform_2(%arg0: i32) -> i32 {
    %c0_i32 = arith.constant 0 : i32
    %c0_i32_0 = arith.constant 0 : i32
    return %c0_i32 : i32
  }
  func.func @transform_3(%arg0: i32) -> (i32, i32) {
    %c0_i32 = arith.constant 0 : i32
    %c0_i32_0 = arith.constant 0 : i32
    return %arg0, %c0_i32 : i32, i32
  }
}

</mosaic_0001>

<bundles_post_ra>
// kernel: tpu_custom_call.1
= control target key start
LH: loop header
LB: loop body
LE: loop exit
PB: predicated region body
PF: predicated region fallthrough
CT: control target
= control target key end

     0   :  { %9 = vsyncpa [#allocation4], 0  ;;  %s77_s15 = smov [#allocation3]   ;;  %s110_s0 = inlined_call_operand.hbm [shape: f32[8,32], index: 0, kind: input, shape index: {}]   ;;  %s111_s1 = inlined_call_operand.vmem [shape: f32[1,32], index: 1, kind: input, shape index: {}]   ;;  %s112_s2 = inlined_call_operand.<no memory space> [shape: f32[1], index: 2, kind: input, shape index: {}]   ;;  %s113_s3 = inlined_call_operand.vmem [shape: f32[8,1], index: 3, kind: output, shape index: {}]  }
   0x1   :  { %s15_s14 = sshll.u32 %s110_s0, 4  ;;  %s17_s16 = sshll.u32 %s77_s15, 4  ;;  %s16_s14 = int_to_ptr.hbm [resolvable:$true] %s15_s14  ;;  %s18_s16 = int_to_ptr.vmem [resolvable:$true] %s17_s16 }
   0x2   :  { %20 = dma.hbm_to_vmem [thread:$0]  %s16_s14, 128, %s18_s16, [#allocation4]  }
   0x3   :  { %75 = dma.done.wait [#allocation4], 128  }
   0x4   :  { %76 = vsyncadd [#allocation4], 4294967168  ;;  %v29_v0 = vld [vmem:[#allocation3] sm:$0xff]  ;;  %vm35_vm0 = vcmask 261120   ;;  %v40_v4 = vstv %s112_s2  ;;  %vm42_vm1 = vcmask 7168  }
   0x5   :  { %v50_v1 = vld [vmem:[%s111_s1] ss:$0 sm:$0xff] }
   0x6   :  { %v34_v2 = vmul.f32 %v50_v1, %v29_v0 }
   0x8   :  { %v36_v3 = vsel %vm35_vm0, %v34_v2, 0.0 }
   0x9   :  { %37 = vadd.xlane.f32.xlu0 %v36_v3 }
  0x7c   :  { %v38_v5 = vpop.xlane.xlu0 %37 }
  0x7d   :  { %v41_v6 = vadd.f32 %v40_v4, %v38_v5 }
  0x7f   :  { %43 = vst.msk [vmem:[%s113_s3] sm:$0xff] %vm42_vm1, %v41_v6 }
  0x80   :  { %48 = vsyncpa [#allocation4], 1 }

</bundles_post_ra>
